<compile_context>
chip_gen: v7x
topology: tpu7x:2x2x1
jax: 0.10.0
libtpu: 0.0.40
codegen_flags: <defaults>
</compile_context>

<pallas_src>
import math

import jax
import jax.numpy as jnp
from jax.experimental import pallas as pl
from jax.experimental.pallas import tpu as pltpu


# ------------------------- Pallas kernel -------------------------

def _diffuse_kernel(sa_ref, sb_ref, img_ref, noise_ref, out_ref):
    """One grid step = one (BT, NT) tile.

    sa_ref    : VMEM f32[BT, 1]  per-row sqrt(alpha_hat[t])
    sb_ref    : VMEM f32[BT, 1]  per-row sqrt(1 - alpha_hat[t])
    img_ref   : VMEM [BT, NT]    image tile (native dtype)
    noise_ref : VMEM [BT, NT]    gaussian noise tile (native dtype)
    out_ref   : VMEM [BT, NT]    noised image tile
    """
    x = img_ref[...].astype(jnp.float32)
    z = noise_ref[...].astype(jnp.float32)
    sa = sa_ref[...]                      # (BT, 1) f32, lane-broadcasts
    sb = sb_ref[...]
    out_ref[...] = (sa * x + sb * z).astype(out_ref.dtype)


# ------------------------- Scheduler (JAX side) -------------------------

class SchedulerPallas:
    def __init__(self, timesteps=1000, beta_start=1e-4, beta_end=0.02):
        self.t = timesteps
        self.beta = jnp.linspace(beta_start, beta_end, timesteps, dtype=jnp.float32)
        self.alpha = 1.0 - self.beta
        self.alpha_hat = jnp.cumprod(self.alpha, axis=0)

    def forward(self, img, t, key=None):
        """img : [B, C, H, W] (NCHW, native dtype kept for kernel I/O)
           t   : i32[B] per-batch timestep indices
           key : jax PRNG key for the gaussian noise (defaults to PRNGKey(0))."""
        if key is None:
            key = jax.random.PRNGKey(0)

        B = img.shape[0]
        N = math.prod(img.shape[1:])

        ah_t = self.alpha_hat[t].astype(jnp.float32)             # [B]
        sa = jnp.sqrt(ah_t).reshape(B, 1)                        # sqrt(alpha_hat[t])
        sb = jnp.sqrt(1.0 - ah_t).reshape(B, 1)                  # sqrt(1 - alpha_hat[t])

        img_flat = img.reshape(B, N)                             # no dtype upcast
        noise_flat = jax.random.normal(key, (B, N), dtype=img.dtype)

        # Tile choices: sublane-quantum rows, lane-dense (>=128, <=2048) cols.
        BT = B if B <= 8 else 8
        NT = N if (N % 128 != 0) else min(N, 2048)
        grid = (pl.cdiv(B, BT), pl.cdiv(N, NT))

        noised_flat = pl.pallas_call(
            _diffuse_kernel,
            out_shape=jax.ShapeDtypeStruct((B, N), img.dtype),
            grid=grid,
            in_specs=[
                pl.BlockSpec((BT, 1), lambda i, j: (i, 0)),          # sa
                pl.BlockSpec((BT, 1), lambda i, j: (i, 0)),          # sb
                pl.BlockSpec((BT, NT), lambda i, j: (i, j)),         # img tile
                pl.BlockSpec((BT, NT), lambda i, j: (i, j)),         # noise tile
            ],
            out_specs=pl.BlockSpec((BT, NT), lambda i, j: (i, j)),   # noised tile
            compiler_params=pltpu.CompilerParams(
                dimension_semantics=("parallel", "parallel"),
                vmem_limit_bytes=32 * 1024 * 1024,
            ),
        )(sa, sb, img_flat, noise_flat)

        return noised_flat.reshape(img.shape), noise_flat.reshape(img.shape)

    # TODO(synk): sample_step (reverse diffusion step) is plain scalar math +
    # one elementwise op and is left to XLA (not part of forward()).


# ------------------------- driver -------------------------

if __name__ == "__main__":
    key = jax.random.PRNGKey(0)
    k_img, k_noise = jax.random.split(key)

    B, C, H, W = 2, 4, 16, 16          # small NCHW example
    img = jax.random.normal(k_img, (B, C, H, W), dtype=jnp.float32)
    t = jnp.array([5, 500], dtype=jnp.int32)

    sched = SchedulerPallas(timesteps=1000, beta_start=1e-4, beta_end=0.02)

    noised, noise = sched.forward(img, t, key=k_noise)
    noised = jax.block_until_ready(noised)
    noise = jax.block_until_ready(noise)

    assert noised.shape == img.shape and noise.shape == img.shape
    assert noised.dtype == img.dtype and noise.dtype == img.dtype

    # Reference mix using the exact noise returned (same semantics as the
    # PyTorch module: it returns the noise it used).
    ah_t = sched.alpha_hat[t]
    sa_ref = jnp.sqrt(ah_t)[:, None, None, None]
    sb_ref = jnp.sqrt(1.0 - ah_t)[:, None, None, None]
    ref = sa_ref * img + sb_ref * noise
    assert jnp.allclose(noised, ref, atol=1e-5, rtol=1e-5)

    # Loose sanity checks on the gaussian noise (2048 samples, fixed key).
    assert bool(jnp.all(jnp.isfinite(noise)))
    assert abs(float(jnp.mean(noise))) < 0.25
    assert abs(float(jnp.std(noise)) - 1.0) < 0.25

    print("KERNEL_OK")
</pallas_src>

<mosaic_0001>
module attributes {stable_mosaic.version = 11 : i64} {
  func.func @_diffuse_kernel(%arg0: i32, %arg1: i32, %arg2: memref<2x1xf32, #tpu.memory_space<vmem>>, %arg3: memref<2x1xf32, #tpu.memory_space<vmem>>, %arg4: memref<2x1024xf32, #tpu.memory_space<vmem>>, %arg5: memref<2x1024xf32, #tpu.memory_space<vmem>>, %arg6: memref<2x1024xf32, #tpu.memory_space<vmem>>) attributes {dimension_semantics = [#tpu.dimension_semantics<parallel>, #tpu.dimension_semantics<parallel>], iteration_bounds = array<i64: 1, 1>, scalar_prefetch = 0 : i64, scratch_operands = 0 : i64, tpu.core_type = #tpu.core_type<tc>, window_params = [{transform_indices = @transform_0, window_bounds = array<i64: 2, 1>}, {transform_indices = @transform_1, window_bounds = array<i64: 2, 1>}, {transform_indices = @transform_2, window_bounds = array<i64: 2, 1024>}, {transform_indices = @transform_3, window_bounds = array<i64: 2, 1024>}, {transform_indices = @transform_4, window_bounds = array<i64: 2, 1024>}]} {
    %c0 = arith.constant 0 : index
    %c0_0 = arith.constant 0 : index
    %0 = vector.load %arg4[%c0, %c0_0] : memref<2x1024xf32, #tpu.memory_space<vmem>>, vector<2x1024xf32>
    %c0_1 = arith.constant 0 : index
    %c0_2 = arith.constant 0 : index
    %1 = vector.load %arg5[%c0_1, %c0_2] : memref<2x1024xf32, #tpu.memory_space<vmem>>, vector<2x1024xf32>
    %c0_3 = arith.constant 0 : index
    %c0_4 = arith.constant 0 : index
    %2 = vector.load %arg2[%c0_3, %c0_4] : memref<2x1xf32, #tpu.memory_space<vmem>>, vector<2x1xf32>
    %c0_5 = arith.constant 0 : index
    %c0_6 = arith.constant 0 : index
    %3 = vector.load %arg3[%c0_5, %c0_6] : memref<2x1xf32, #tpu.memory_space<vmem>>, vector<2x1xf32>
    %4 = vector.broadcast %2 : vector<2x1xf32> to vector<2x1024xf32>
    %5 = arith.mulf %4, %0 : vector<2x1024xf32>
    %6 = vector.broadcast %3 : vector<2x1xf32> to vector<2x1024xf32>
    %7 = arith.mulf %6, %1 : vector<2x1024xf32>
    %8 = arith.addf %5, %7 : vector<2x1024xf32>
    %c0_7 = arith.constant 0 : index
    %c0_8 = arith.constant 0 : index
    %9 = vector.load %arg6[%c0_7, %c0_8] : memref<2x1024xf32, #tpu.memory_space<vmem>>, vector<2x1024xf32>
    tpu.vector_store %arg6[%c0_7, %c0_8], %8 {strides = array<i32>} : memref<2x1024xf32, #tpu.memory_space<vmem>>, vector<2x1024xf32>,
    return
  }
  func.func @transform_0(%arg0: i32, %arg1: i32) -> (i32, i32) {
    %c0_i32 = arith.constant 0 : i32
    %c0_i32_0 = arith.constant 0 : i32
    return %arg0, %c0_i32 : i32, i32
  }
  func.func @transform_1(%arg0: i32, %arg1: i32) -> (i32, i32) {
    %c0_i32 = arith.constant 0 : i32
    %c0_i32_0 = arith.constant 0 : i32
    return %arg0, %c0_i32 : i32, i32
  }
  func.func @transform_2(%arg0: i32, %arg1: i32) -> (i32, i32) {
    %c0_i32 = arith.constant 0 : i32
    return %arg0, %arg1 : i32, i32
  }
  func.func @transform_3(%arg0: i32, %arg1: i32) -> (i32, i32) {
    %c0_i32 = arith.constant 0 : i32
    return %arg0, %arg1 : i32, i32
  }
  func.func @transform_4(%arg0: i32, %arg1: i32) -> (i32, i32) {
    %c0_i32 = arith.constant 0 : i32
    return %arg0, %arg1 : i32, i32
  }
}

</mosaic_0001>

<bundles_post_ra>
// kernel: tpu_custom_call.1
= control target key start
LH: loop header
LB: loop body
LE: loop exit
PB: predicated region body
PF: predicated region fallthrough
CT: control target
= control target key end

     0   :  { %9 = vsyncpa [#allocation3], 0  ;;  %s341_s0 = inlined_call_operand.vmem [shape: f32[2,1], index: 0, kind: input, shape index: {}]   ;;  %s342_s1 = inlined_call_operand.vmem [shape: f32[2,1], index: 1, kind: input, shape index: {}]   ;;  %s343_s2 = inlined_call_operand.hbm [shape: f32[2,1024], index: 2, kind: input, shape index: {}]   ;;  %s344_s3 = inlined_call_operand.vmem [shape: f32[2,1024], index: 3, kind: input, shape index: {}]   ;;  %s345_s4 = inlined_call_operand.hbm [shape: f32[2,1024], index: 4, kind: output, shape index: {}]  }
   0x1   :  { %10 = vsyncpa [#allocation4], 0  ;;  %s276_s15 = smov [#allocation2]   ;;  %s228_s19 = scalar_lea.hbm %s343_s2, 256 }
   0x2   :  { %s21_s16 = sshll.u32 %s276_s15, 4  ;;  %p229_p0 = scmp.ne.s32.totalorder %s343_s2, %s228_s19  ;;  %s22_s16 = int_to_ptr.vmem [resolvable:$true] %s21_s16 }
   0x3   :  { %p232_p1 = scmp.lt.u32.totalorder %s228_s19, %s343_s2 }
   0x5   :  { %p234_p2 = pnand %p232_p1, %p229_p0 }
   0x7   :  { %237 = shalt.err (!%p234_p2)
}
   0x8   :  { %s238_s24 = scalar_lea.vmem %s22_s16, 256  ;;  %p243_p4 = scmp.lt.s32.totalorder %s22_s16, %s22_s16 }
   0x9   :  { %p239_p3 = scmp.ne.s32.totalorder %s22_s16, %s238_s24  ;;  %p244_p5 = scmp.lt.s32.totalorder %s238_s24, %s238_s24 }
   0xb   :  { %p245_p6 = por %p244_p5, %p243_p4 }
   0xd   :  { %p246_p7 = pnand %p245_p6, %p239_p3 }
   0xf   :  { %249 = shalt.err (!%p246_p7)
}
  0x10   :  { %24 = dma.hbm_to_vmem [thread:$0]  %s343_s2, 256, %s22_s16, [#allocation3]  }
  0x11   :  { %272 = dma.done.wait [#allocation3], 256  }
  0x12   :  { %273 = vsyncadd [#allocation3], 4294967040  ;;  %v277_v0 = vmov 0   ;;  %v34_v1 = vld [vmem:[%s341_s0] sm:$0x3]  ;;  %v47_v5 = vlaneseq  ;;  %v30_v8 = vld [vmem:[#allocation2] sm:$0xff] }
  0x13   :  { %223 = vset.pattern.permute.xlu0 %v277_v0  ;;  %v35_v2 = vld [vmem:[%s342_s1] sm:$0x3]  ;;  %v278_v3 = vmov 1983009808   ;;  %v33_v11 = vld [vmem:[%s344_s3 + $0x8] sm:$0xff]  ;;  %v43_v12 = vcombine.high %v30_v8, %v30_v8  ;;  %s279_s0 = smov [#allocation5]  }
  0x14   :  { %38 = vperm.xlu0 %223, %v34_v1   ;;  %v45_v4 = vunpack.c.l.s4 %v278_v3  ;;  %v48_v7 = vshrl.u32 %v47_v5, 7  ;;  %v31_v9 = vld [vmem:[#allocation2 + $0x8] sm:$0xff]  ;;  %v117_v16 = vcombine.high %v33_v11, %v33_v11  ;;  %s210_s1 = sshll.u32 %s279_s0, 4  ;;  %s211_s1 = int_to_ptr.vmem [resolvable:$true] %s210_s1 }
  0x15   :  { %v32_v10 = vld [vmem:[%s344_s3] sm:$0xff]  ;;  %v60_v14 = vcombine.high %v31_v9, %v31_v9  ;;  %s250_s3 = scalar_lea.vmem %s211_s1, 256  ;;  %p255_p9 = scmp.lt.s32.totalorder %s211_s1, %s211_s1 }
  0x16   :  { %v46_v6 = vunpack.c.0.s8 %v45_v4  ;;  %v100_v15 = vcombine.high %v32_v10, %v32_v10  ;;  %p251_p8 = scmp.ne.s32.totalorder %s211_s1, %s250_s3  ;;  %p256_p10 = scmp.lt.s32.totalorder %s250_s3, %s250_s3 }
  0x18   :  { %95 = vperm.xlu0 %223, %v35_v2   ;;  %v49_v13 = vsub.s32 %v46_v6, %v48_v7  ;;  %p257_p11 = por %p256_p10, %p255_p9 }
  0x1a   :  { %v50_v17 = vrot.slane %v30_v8, %v49_v13  ;;  %v57_v18 = vrot.slane %v43_v12, %v49_v13  ;;  %v67_v19 = vrot.slane %v31_v9, %v49_v13  ;;  %v74_v20 = vrot.slane %v60_v14, %v49_v13  ;;  %p258_p12 = pnand %p257_p11, %p251_p8 }
  0x1b   :  { %v107_v21 = vrot.slane %v32_v10, %v49_v13  ;;  %v114_v22 = vrot.slane %v100_v15, %v49_v13  ;;  %v124_v23 = vrot.slane %v33_v11, %v49_v13  ;;  %v131_v24 = vrot.slane %v117_v16, %v49_v13 }
  0x1c   :  { %v58_v25 = vcombine.high %v50_v17, %v50_v17  ;;  %v59_v26 = vcombine.high %v57_v18, %v57_v18  ;;  %v75_v28 = vcombine.high %v67_v19, %v67_v19  ;;  %v76_v29 = vcombine.high %v74_v20, %v74_v20 }
  0x1d   :  { %v115_v30 = vcombine.high %v107_v21, %v107_v21  ;;  %v116_v31 = vcombine.high %v114_v22, %v114_v22  ;;  %v132_v32 = vcombine.high %v124_v23, %v124_v23  ;;  %v133_v33 = vcombine.high %v131_v24, %v131_v24 }
  0x93   :  { %v39_v27 = vpop.permute.xlu0 %38 }
  0x94   :  { %v85_v34 = vmul.f32 %v50_v17, %v39_v27  ;;  %v86_v35 = vmul.f32 %v58_v25, %v39_v27  ;;  %v87_v36 = vmul.f32 %v57_v18, %v39_v27  ;;  %v88_v37 = vmul.f32 %v59_v26, %v39_v27 }
  0x95   :  { %v89_v39 = vmul.f32 %v67_v19, %v39_v27  ;;  %v90_v40 = vmul.f32 %v75_v28, %v39_v27  ;;  %v91_v41 = vmul.f32 %v74_v20, %v39_v27  ;;  %v92_v42 = vmul.f32 %v76_v29, %v39_v27 }
  0x97   :  { %v96_v38 = vpop.permute.xlu0 %95 }
  0x98   :  { %v142_v43 = vmul.f32 %v107_v21, %v96_v38  ;;  %v143_v44 = vmul.f32 %v115_v30, %v96_v38  ;;  %v144_v45 = vmul.f32 %v114_v22, %v96_v38  ;;  %v145_v46 = vmul.f32 %v116_v31, %v96_v38 }
  0x99   :  { %v146_v47 = vmul.f32 %v124_v23, %v96_v38  ;;  %v147_v48 = vmul.f32 %v132_v32, %v96_v38  ;;  %v148_v49 = vmul.f32 %v131_v24, %v96_v38  ;;  %v149_v50 = vmul.f32 %v133_v33, %v96_v38 }
  0x9a   :  { %v150_v51 = vadd.f32 %v142_v43, %v85_v34  ;;  %v151_v52 = vadd.f32 %v143_v44, %v86_v35  ;;  %v152_v53 = vadd.f32 %v144_v45, %v87_v36  ;;  %v153_v54 = vadd.f32 %v145_v46, %v88_v37 }
  0x9b   :  { %v154_v55 = vadd.f32 %v146_v47, %v89_v39  ;;  %v155_v56 = vadd.f32 %v147_v48, %v90_v40  ;;  %v156_v57 = vadd.f32 %v148_v49, %v91_v41  ;;  %v157_v58 = vadd.f32 %v149_v50, %v92_v42 }
  0x9c   :  { %v166_v59 = vcombine.low %v150_v51, %v151_v52  ;;  %v167_v60 = vcombine.low %v152_v53, %v153_v54 }
  0x9d   :  { %v183_v61 = vcombine.low %v154_v55, %v155_v56  ;;  %v184_v62 = vcombine.low %v156_v57, %v157_v58 }
  0x9e   :  { %v174_v63 = vrot.slane %v166_v59, %v49_v13  ;;  %v181_v0 = vrot.slane %v167_v60, %v49_v13 }
  0x9f   :  { %v191_v1 = vrot.slane %v183_v61, %v49_v13  ;;  %v198_v2 = vrot.slane %v184_v62, %v49_v13 }
  0xa0   :  { %v182_v3 = vcombine.low %v174_v63, %v181_v0 }
  0xa1   :  { %v199_v4 = vcombine.low %v191_v1, %v198_v2 }
  0xa2   :  { %202 = vst [vmem:[#allocation5] sm:$0xff] %v182_v3 }
  0xa3   :  { %203 = vst [vmem:[#allocation5 + $0x8] sm:$0xff] %v199_v4 }
  0xa4   :  { %261 = shalt.err (!%p258_p12)
}
  0xa5   :  { %s262_s10 = scalar_lea.hbm %s345_s4, 256 }
  0xa6   :  { %p263_p13 = scmp.ne.s32.totalorder %s345_s4, %s262_s10  ;;  %p266_p0 = scmp.lt.u32.totalorder %s262_s10, %s345_s4 }
  0xa8   :  { %p268_p1 = pnand %p266_p0, %p263_p13 }
  0xaa   :  { %271 = shalt.err (!%p268_p1)
}
  0xab   :  { %213 = dma.vmem_to_hbm [thread:$0]  %s211_s1, 256, %s345_s4, [#allocation4]  }
  0xac   :  { %274 = dma.done.wait [#allocation4], 256  }
  0xad   :  { %275 = vsyncadd [#allocation4], 4294967040 }
  0xae   :  { %217 = vsyncpa [#allocation3], 1 }
  0xaf   :  { %218 = vsyncpa [#allocation4], 1 }

</bundles_post_ra>
